<compile_context>
chip_gen: v6e
topology: v6e:2x2x1
jax: 0.10.0
libtpu: 0.0.40
codegen_flags: <defaults>
</compile_context>

<pallas_src>
import jax
import jax.numpy as jnp
import numpy as np
from jax.experimental import pallas as pl
from jax.experimental.pallas import tpu as pltpu

_BN_EPS = 1e-5
_VMEM_LIMIT = 32 * 1024 * 1024  # safe scoped limit on v5e/v6e/v7x; tiles here are tiny
_LANE_TILE = 1024               # cap for the P tile (multiple of 128)


def _round_up(x, m):
    return (x + m - 1) // m * m


# ---------------- Pass 1: per-channel sum / sum-of-squares of y = W @ X ----------------
def _stats_kernel(xr_ref, xi_ref, wrr_ref, wri_ref, wir_ref, wii_ref,
                  sr_ref, qr_ref, si_ref, qi_ref):
    @pl.when(pl.program_id(0) == 0)
    def _():
        sr_ref[...] = jnp.zeros_like(sr_ref)
        qr_ref[...] = jnp.zeros_like(qr_ref)
        si_ref[...] = jnp.zeros_like(si_ref)
        qi_ref[...] = jnp.zeros_like(qi_ref)

    xr = xr_ref[...]
    xi = xi_ref[...]
    yr = (jnp.dot(wrr_ref[...], xr, preferred_element_type=jnp.float32)
          + jnp.dot(wri_ref[...], xi, preferred_element_type=jnp.float32))
    yi = (jnp.dot(wir_ref[...], xr, preferred_element_type=jnp.float32)
          + jnp.dot(wii_ref[...], xi, preferred_element_type=jnp.float32))
    sr_ref[...] += jnp.sum(yr, axis=1, keepdims=True)
    qr_ref[...] += jnp.sum(yr * yr, axis=1, keepdims=True)
    si_ref[...] += jnp.sum(yi, axis=1, keepdims=True)
    qi_ref[...] += jnp.sum(yi * yi, axis=1, keepdims=True)


def _stats_call(xr, xi, wrr, wri, wir, wii, tp):
    ch, ppad = xr.shape
    num_t = ppad // tp
    x_spec = pl.BlockSpec((ch, tp), lambda i: (0, i))
    w_spec = pl.BlockSpec((ch, ch), lambda i: (0, 0))
    s_spec = pl.BlockSpec((ch, 1), lambda i: (0, 0))
    return pl.pallas_call(
        _stats_kernel,
        out_shape=tuple(jax.ShapeDtypeStruct((ch, 1), jnp.float32) for _ in range(4)),
        grid=(num_t,),
        in_specs=[x_spec, x_spec, w_spec, w_spec, w_spec, w_spec],
        out_specs=[s_spec, s_spec, s_spec, s_spec],
        compiler_params=pltpu.CompilerParams(
            dimension_semantics=("arbitrary",),
            vmem_limit_bytes=_VMEM_LIMIT),
    )(xr, xi, wrr, wri, wir, wii)


# -------- Pass 2: recompute y, apply folded BN scale/shift + ReLU, store tiles --------
def _norm_kernel(xr_ref, xi_ref, wrr_ref, wri_ref, wir_ref, wii_ref,
                 scr_ref, shr_ref, sci_ref, shi_ref, or_ref, oi_ref):
    xr = xr_ref[...]
    xi = xi_ref[...]
    yr = (jnp.dot(wrr_ref[...], xr, preferred_element_type=jnp.float32)
          + jnp.dot(wri_ref[...], xi, preferred_element_type=jnp.float32))
    yi = (jnp.dot(wir_ref[...], xr, preferred_element_type=jnp.float32)
          + jnp.dot(wii_ref[...], xi, preferred_element_type=jnp.float32))
    or_ref[...] = jnp.maximum(yr * scr_ref[...] + shr_ref[...], 0.0)
    oi_ref[...] = jnp.maximum(yi * sci_ref[...] + shi_ref[...], 0.0)


def _norm_call(xr, xi, wrr, wri, wir, wii, scr, shr, sci, shi, tp):
    ch, ppad = xr.shape
    num_t = ppad // tp
    x_spec = pl.BlockSpec((ch, tp), lambda i: (0, i))
    w_spec = pl.BlockSpec((ch, ch), lambda i: (0, 0))
    v_spec = pl.BlockSpec((ch, 1), lambda i: (0, 0))
    o_spec = pl.BlockSpec((ch, tp), lambda i: (0, i))
    return pl.pallas_call(
        _norm_kernel,
        out_shape=(jax.ShapeDtypeStruct((ch, ppad), jnp.float32),
                   jax.ShapeDtypeStruct((ch, ppad), jnp.float32)),
        grid=(num_t,),
        in_specs=[x_spec, x_spec, w_spec, w_spec, w_spec, w_spec,
                  v_spec, v_spec, v_spec, v_spec],
        out_specs=[o_spec, o_spec],
        compiler_params=pltpu.CompilerParams(
            dimension_semantics=("parallel",),
            vmem_limit_bytes=_VMEM_LIMIT),
    )(xr, xi, wrr, wri, wir, wii, scr, shr, sci, shi)


def fourier_unit(x, conv_w, bn_gamma, bn_beta, lane_tile=_LANE_TILE):
    """Port of FourierUnit.forward.  x: (B, C, H, W) NCHW; requires 2*B*C == n_features
    (implied by the module's view((1,-1)+...) feeding Conv2d(n_features, ...))."""
    b, c, h, w = x.shape
    nf = conv_w.shape[0]
    assert 2 * b * c == nf, "torch view (1,-1,...) requires 2*B*C == n_features"
    ch = nf // 2  # = B*C

    xf = x.astype(jnp.float32)
    # TODO(synk): rfftn/irfftn have no Pallas TPU primitive; FFTs are jnp.fft glue.
    ffted = jnp.fft.rfft2(xf, norm="ortho")          # (B, C, H, W2) complex64
    w2 = w // 2 + 1
    p = h * w2

    # Channels-major real/imag slabs; the torch stack+permute interleave is handled
    # by parity-splitting the conv weight instead of moving data.
    xr = ffted.real.reshape(ch, p)
    xi = ffted.imag.reshape(ch, p)

    # Lane-dense padding of P (zeros -> W @ 0 = 0, so stats stay exact).
    tp = min(lane_tile, _round_up(p, 128))
    ppad = _round_up(p, tp)
    if ppad != p:
        xr = jnp.pad(xr, ((0, 0), (0, ppad - p)))
        xi = jnp.pad(xi, ((0, 0), (0, ppad - p)))

    # Parity-split 1x1 conv weight: conv-input channel 2k = Re, 2k+1 = Im;
    # conv-output channel 2j = Re, 2j+1 = Im of the post-conv complex tensor.
    wrr = conv_w[0::2, 0::2]
    wri = conv_w[0::2, 1::2]
    wir = conv_w[1::2, 0::2]
    wii = conv_w[1::2, 1::2]

    # Pass 1: streaming per-channel sum / sum-of-squares of y.
    sr, qr, si, qi = _stats_call(xr, xi, wrr, wri, wir, wii, tp)

    # Fold BatchNorm (training-mode batch stats, biased var) + affine into scale/shift.
    inv_p = jnp.float32(1.0 / p)
    mean_r = sr * inv_p
    mean_i = si * inv_p
    var_r = qr * inv_p - mean_r * mean_r
    var_i = qi * inv_p - mean_i * mean_i
    g_r = bn_gamma[0::2].reshape(ch, 1).astype(jnp.float32)
    g_i = bn_gamma[1::2].reshape(ch, 1).astype(jnp.float32)
    b_r = bn_beta[0::2].reshape(ch, 1).astype(jnp.float32)
    b_i = bn_beta[1::2].reshape(ch, 1).astype(jnp.float32)
    scale_r = g_r * jax.lax.rsqrt(var_r + _BN_EPS)
    scale_i = g_i * jax.lax.rsqrt(var_i + _BN_EPS)
    shift_r = b_r - mean_r * scale_r
    shift_i = b_i - mean_i * scale_i

    # Pass 2: recompute y, normalize + ReLU, store lane-dense real/imag slabs.
    yr, yi = _norm_call(xr, xi, wrr, wri, wir, wii,
                        scale_r, shift_r, scale_i, shift_i, tp)

    yr = yr[:, :p].reshape(1, ch, h, w2)
    yi = yi[:, :p].reshape(1, ch, h, w2)
    comp = jax.lax.complex(yr, yi)                   # (1, B*C, H, W2)
    out = jnp.fft.irfft2(comp, s=(h, w), norm="ortho")
    return out


def _reference(x, conv_w, gamma, beta):
    """Pure-JAX reference mirroring the torch forward (for correctness check)."""
    b, c, h, w = x.shape
    nf = conv_w.shape[0]
    xf = x.astype(jnp.float32)
    ffted = jnp.fft.rfft2(xf, norm="ortho")
    w2 = w // 2 + 1
    slab = jnp.transpose(jnp.stack((ffted.real, ffted.imag), axis=-1),
                         (0, 1, 4, 2, 3)).reshape(nf, h * w2)
    y = conv_w @ slab
    mean = y.mean(axis=1, keepdims=True)
    var = ((y - mean) ** 2).mean(axis=1, keepdims=True)
    y = (y - mean) / jnp.sqrt(var + _BN_EPS) * gamma.reshape(-1, 1) + beta.reshape(-1, 1)
    y = jnp.maximum(y, 0.0)
    y = jnp.transpose(y.reshape(1, nf // 2, 2, h, w2), (0, 1, 3, 4, 2))
    comp = y[..., 0] + 1j * y[..., 1]
    return jnp.fft.irfft2(comp, s=(h, w), norm="ortho")


if __name__ == "__main__":
    key = jax.random.PRNGKey(0)
    kx, kw = jax.random.split(key)

    B, C, H, W = 2, 4, 16, 16
    n_features = 2 * B * C  # = 16, required by the (1,-1) view feeding Conv2d(n_features, ...)

    x = jax.random.normal(kx, (B, C, H, W), dtype=jnp.float32)

    # Parameter init (shapes from __init__):
    #   Conv2d(n_features, n_features, 1, bias=False) weight -> (nf, nf) (1x1 kernel squeezed)
    #   BatchNorm2d(n_features): weight=1, bias=0 (PyTorch defaults, training-mode stats)
    bound = 1.0 / (n_features ** 0.5)
    conv_w = jax.random.uniform(kw, (n_features, n_features), jnp.float32, -bound, bound)
    bn_gamma = jnp.ones((n_features,), jnp.float32)
    bn_beta = jnp.zeros((n_features,), jnp.float32)

    out = fourier_unit(x, conv_w, bn_gamma, bn_beta)
    out = jax.block_until_ready(out)

    assert out.shape == (1, B * C, H, W)
    ref = _reference(x, conv_w, bn_gamma, bn_beta)
    np.testing.assert_allclose(np.asarray(out), np.asarray(ref), rtol=1e-4, atol=1e-4)

    print("KERNEL_OK")
</pallas_src>

<mosaic_0001>
module attributes {stable_mosaic.version = 11 : i64} {
  func.func @_stats_kernel(%arg0: i32, %arg1: memref<8x256xf32, #tpu.memory_space<vmem>>, %arg2: memref<8x256xf32, #tpu.memory_space<vmem>>, %arg3: memref<8x8xf32, #tpu.memory_space<vmem>>, %arg4: memref<8x8xf32, #tpu.memory_space<vmem>>, %arg5: memref<8x8xf32, #tpu.memory_space<vmem>>, %arg6: memref<8x8xf32, #tpu.memory_space<vmem>>, %arg7: memref<8x1xf32, #tpu.memory_space<vmem>>, %arg8: memref<8x1xf32, #tpu.memory_space<vmem>>, %arg9: memref<8x1xf32, #tpu.memory_space<vmem>>, %arg10: memref<8x1xf32, #tpu.memory_space<vmem>>) attributes {dimension_semantics = [#tpu.dimension_semantics<arbitrary>], iteration_bounds = array<i64: 1>, scalar_prefetch = 0 : i64, scratch_operands = 0 : i64, tpu.core_type = #tpu.core_type<tc>, window_params = [{transform_indices = @transform_0, window_bounds = array<i64: 8, 256>}, {transform_indices = @transform_1, window_bounds = array<i64: 8, 256>}, {pipeline_mode = #tpu.pipeline_mode<synchronous>, transform_indices = @transform_2, window_bounds = array<i64: 8, 8>}, {pipeline_mode = #tpu.pipeline_mode<synchronous>, transform_indices = @transform_3, window_bounds = array<i64: 8, 8>}, {pipeline_mode = #tpu.pipeline_mode<synchronous>, transform_indices = @transform_4, window_bounds = array<i64: 8, 8>}, {pipeline_mode = #tpu.pipeline_mode<synchronous>, transform_indices = @transform_5, window_bounds = array<i64: 8, 8>}, {pipeline_mode = #tpu.pipeline_mode<synchronous>, transform_indices = @transform_6, window_bounds = array<i64: 8, 1>}, {pipeline_mode = #tpu.pipeline_mode<synchronous>, transform_indices = @transform_7, window_bounds = array<i64: 8, 1>}, {pipeline_mode = #tpu.pipeline_mode<synchronous>, transform_indices = @transform_8, window_bounds = array<i64: 8, 1>}, {pipeline_mode = #tpu.pipeline_mode<synchronous>, transform_indices = @transform_9, window_bounds = array<i64: 8, 1>}]} {
    %c0_i32 = arith.constant 0 : i32
    %0 = arith.cmpi eq, %arg0, %c0_i32 : i32
    %1 = arith.extui %0 : i1 to i32
    %c0_i32_0 = arith.constant 0 : i32
    %2 = arith.cmpi ne, %1, %c0_i32_0 : i32
    scf.if %2 {
      %cst_35 = arith.constant 0.000000e+00 : f32
      %37 = vector.broadcast %cst_35 : f32 to vector<8x1xf32>
      %c0_36 = arith.constant 0 : index
      %c0_37 = arith.constant 0 : index
      %38 = vector.load %arg7[%c0_36, %c0_37] : memref<8x1xf32, #tpu.memory_space<vmem>>, vector<8x1xf32>
      tpu.vector_store %arg7[%c0_36, %c0_37], %37 {strides = array<i32>} : memref<8x1xf32, #tpu.memory_space<vmem>>, vector<8x1xf32>,
      %cst_38 = arith.constant 0.000000e+00 : f32
      %39 = vector.broadcast %cst_38 : f32 to vector<8x1xf32>
      %c0_39 = arith.constant 0 : index
      %c0_40 = arith.constant 0 : index
      %40 = vector.load %arg8[%c0_39, %c0_40] : memref<8x1xf32, #tpu.memory_space<vmem>>, vector<8x1xf32>
      tpu.vector_store %arg8[%c0_39, %c0_40], %39 {strides = array<i32>} : memref<8x1xf32, #tpu.memory_space<vmem>>, vector<8x1xf32>,
      %cst_41 = arith.constant 0.000000e+00 : f32
      %41 = vector.broadcast %cst_41 : f32 to vector<8x1xf32>
      %c0_42 = arith.constant 0 : index
      %c0_43 = arith.constant 0 : index
      %42 = vector.load %arg9[%c0_42, %c0_43] : memref<8x1xf32, #tpu.memory_space<vmem>>, vector<8x1xf32>
      tpu.vector_store %arg9[%c0_42, %c0_43], %41 {strides = array<i32>} : memref<8x1xf32, #tpu.memory_space<vmem>>, vector<8x1xf32>,
      %cst_44 = arith.constant 0.000000e+00 : f32
      %43 = vector.broadcast %cst_44 : f32 to vector<8x1xf32>
      %c0_45 = arith.constant 0 : index
      %c0_46 = arith.constant 0 : index
      %44 = vector.load %arg10[%c0_45, %c0_46] : memref<8x1xf32, #tpu.memory_space<vmem>>, vector<8x1xf32>
      tpu.vector_store %arg10[%c0_45, %c0_46], %43 {strides = array<i32>} : memref<8x1xf32, #tpu.memory_space<vmem>>, vector<8x1xf32>,
    } else {
    }
    %c0 = arith.constant 0 : index
    %c0_1 = arith.constant 0 : index
    %3 = vector.load %arg1[%c0, %c0_1] : memref<8x256xf32, #tpu.memory_space<vmem>>, vector<8x256xf32>
    %c0_2 = arith.constant 0 : index
    %c0_3 = arith.constant 0 : index
    %4 = vector.load %arg2[%c0_2, %c0_3] : memref<8x256xf32, #tpu.memory_space<vmem>>, vector<8x256xf32>
    %c0_4 = arith.constant 0 : index
    %c0_5 = arith.constant 0 : index
    %5 = vector.load %arg3[%c0_4, %c0_5] : memref<8x8xf32, #tpu.memory_space<vmem>>, vector<8x8xf32>
    %cst = arith.constant dense<0.000000e+00> : vector<8x256xf32>
    %6 = tpu.matmul %5, %3, %cst {dimension_numbers = #tpu.dot_dimension_numbers<[1], [0], [0], [1], [0, 0, 1, 1], [], []>} : vector<8x8xf32>, vector<8x256xf32>, vector<8x256xf32> -> vector<8x256xf32>
    %c0_6 = arith.constant 0 : index
    %c0_7 = arith.constant 0 : index
    %7 = vector.load %arg4[%c0_6, %c0_7] : memref<8x8xf32, #tpu.memory_space<vmem>>, vector<8x8xf32>
    %cst_8 = arith.constant dense<0.000000e+00> : vector<8x256xf32>
    %8 = tpu.matmul %7, %4, %cst_8 {dimension_numbers = #tpu.dot_dimension_numbers<[1], [0], [0], [1], [0, 0, 1, 1], [], []>} : vector<8x8xf32>, vector<8x256xf32>, vector<8x256xf32> -> vector<8x256xf32>
    %9 = arith.addf %6, %8 : vector<8x256xf32>
    %c0_9 = arith.constant 0 : index
    %c0_10 = arith.constant 0 : index
    %10 = vector.load %arg5[%c0_9, %c0_10] : memref<8x8xf32, #tpu.memory_space<vmem>>, vector<8x8xf32>
    %cst_11 = arith.constant dense<0.000000e+00> : vector<8x256xf32>
    %11 = tpu.matmul %10, %3, %cst_11 {dimension_numbers = #tpu.dot_dimension_numbers<[1], [0], [0], [1], [0, 0, 1, 1], [], []>} : vector<8x8xf32>, vector<8x256xf32>, vector<8x256xf32> -> vector<8x256xf32>
    %c0_12 = arith.constant 0 : index
    %c0_13 = arith.constant 0 : index
    %12 = vector.load %arg6[%c0_12, %c0_13] : memref<8x8xf32, #tpu.memory_space<vmem>>, vector<8x8xf32>
    %cst_14 = arith.constant dense<0.000000e+00> : vector<8x256xf32>
    %13 = tpu.matmul %12, %4, %cst_14 {dimension_numbers = #tpu.dot_dimension_numbers<[1], [0], [0], [1], [0, 0, 1, 1], [], []>} : vector<8x8xf32>, vector<8x256xf32>, vector<8x256xf32> -> vector<8x256xf32>
    %14 = arith.addf %11, %13 : vector<8x256xf32>
    %c0_15 = arith.constant 0 : index
    %c0_16 = arith.constant 0 : index
    %15 = vector.load %arg7[%c0_15, %c0_16] : memref<8x1xf32, #tpu.memory_space<vmem>>, vector<8x1xf32>
    %cst_17 = arith.constant dense<0.000000e+00> : vector<8xf32>
    %16 = vector.multi_reduction <add>, %9, %cst_17 [1] : vector<8x256xf32> to vector<8xf32>
    %17 = vector.shape_cast %16 : vector<8xf32> to vector<8x1xf32>
    %18 = arith.addf %15, %17 : vector<8x1xf32>
    %c0_18 = arith.constant 0 : index
    %c0_19 = arith.constant 0 : index
    %19 = vector.load %arg7[%c0_18, %c0_19] : memref<8x1xf32, #tpu.memory_space<vmem>>, vector<8x1xf32>
    tpu.vector_store %arg7[%c0_18, %c0_19], %18 {strides = array<i32>} : memref<8x1xf32, #tpu.memory_space<vmem>>, vector<8x1xf32>,
    %c0_20 = arith.constant 0 : index
    %c0_21 = arith.constant 0 : index
    %20 = vector.load %arg8[%c0_20, %c0_21] : memref<8x1xf32, #tpu.memory_space<vmem>>, vector<8x1xf32>
    %21 = arith.mulf %9, %9 : vector<8x256xf32>
    %cst_22 = arith.constant dense<0.000000e+00> : vector<8xf32>
    %22 = vector.multi_reduction <add>, %21, %cst_22 [1] : vector<8x256xf32> to vector<8xf32>
    %23 = vector.shape_cast %22 : vector<8xf32> to vector<8x1xf32>
    %24 = arith.addf %20, %23 : vector<8x1xf32>
    %c0_23 = arith.constant 0 : index
    %c0_24 = arith.constant 0 : index
    %25 = vector.load %arg8[%c0_23, %c0_24] : memref<8x1xf32, #tpu.memory_space<vmem>>, vector<8x1xf32>
    tpu.vector_store %arg8[%c0_23, %c0_24], %24 {strides = array<i32>} : memref<8x1xf32, #tpu.memory_space<vmem>>, vector<8x1xf32>,
    %c0_25 = arith.constant 0 : index
    %c0_26 = arith.constant 0 : index
    %26 = vector.load %arg9[%c0_25, %c0_26] : memref<8x1xf32, #tpu.memory_space<vmem>>, vector<8x1xf32>
    %cst_27 = arith.constant dense<0.000000e+00> : vector<8xf32>
    %27 = vector.multi_reduction <add>, %14, %cst_27 [1] : vector<8x256xf32> to vector<8xf32>
    %28 = vector.shape_cast %27 : vector<8xf32> to vector<8x1xf32>
    %29 = arith.addf %26, %28 : vector<8x1xf32>
    %c0_28 = arith.constant 0 : index
    %c0_29 = arith.constant 0 : index
    %30 = vector.load %arg9[%c0_28, %c0_29] : memref<8x1xf32, #tpu.memory_space<vmem>>, vector<8x1xf32>
    tpu.vector_store %arg9[%c0_28, %c0_29], %29 {strides = array<i32>} : memref<8x1xf32, #tpu.memory_space<vmem>>, vector<8x1xf32>,
    %c0_30 = arith.constant 0 : index
    %c0_31 = arith.constant 0 : index
    %31 = vector.load %arg10[%c0_30, %c0_31] : memref<8x1xf32, #tpu.memory_space<vmem>>, vector<8x1xf32>
    %32 = arith.mulf %14, %14 : vector<8x256xf32>
    %cst_32 = arith.constant dense<0.000000e+00> : vector<8xf32>
    %33 = vector.multi_reduction <add>, %32, %cst_32 [1] : vector<8x256xf32> to vector<8xf32>
    %34 = vector.shape_cast %33 : vector<8xf32> to vector<8x1xf32>
    %35 = arith.addf %31, %34 : vector<8x1xf32>
    %c0_33 = arith.constant 0 : index
    %c0_34 = arith.constant 0 : index
    %36 = vector.load %arg10[%c0_33, %c0_34] : memref<8x1xf32, #tpu.memory_space<vmem>>, vector<8x1xf32>
    tpu.vector_store %arg10[%c0_33, %c0_34], %35 {strides = array<i32>} : memref<8x1xf32, #tpu.memory_space<vmem>>, vector<8x1xf32>,
    return
  }
  func.func @transform_0(%arg0: i32) -> (i32, i32) {
    %c0_i32 = arith.constant 0 : i32
    %c0_i32_0 = arith.constant 0 : i32
    return %c0_i32, %arg0 : i32, i32
  }
  func.func @transform_1(%arg0: i32) -> (i32, i32) {
    %c0_i32 = arith.constant 0 : i32
    %c0_i32_0 = arith.constant 0 : i32
    return %c0_i32, %arg0 : i32, i32
  }
  func.func @transform_2(%arg0: i32) -> (i32, i32) {
    %c0_i32 = arith.constant 0 : i32
    %c0_i32_0 = arith.constant 0 : i32
    %c0_i32_1 = arith.constant 0 : i32
    return %c0_i32, %c0_i32_0 : i32, i32
  }
  func.func @transform_3(%arg0: i32) -> (i32, i32) {
    %c0_i32 = arith.constant 0 : i32
    %c0_i32_0 = arith.constant 0 : i32
    %c0_i32_1 = arith.constant 0 : i32
    return %c0_i32, %c0_i32_0 : i32, i32
  }
  func.func @transform_4(%arg0: i32) -> (i32, i32) {
    %c0_i32 = arith.constant 0 : i32
    %c0_i32_0 = arith.constant 0 : i32
    %c0_i32_1 = arith.constant 0 : i32
    return %c0_i32, %c0_i32_0 : i32, i32
  }
  func.func @transform_5(%arg0: i32) -> (i32, i32) {
    %c0_i32 = arith.constant 0 : i32
    %c0_i32_0 = arith.constant 0 : i32
    %c0_i32_1 = arith.constant 0 : i32
    return %c0_i32, %c0_i32_0 : i32, i32
  }
  func.func @transform_6(%arg0: i32) -> (i32, i32) {
    %c0_i32 = arith.constant 0 : i32
    %c0_i32_0 = arith.constant 0 : i32
    %c0_i32_1 = arith.constant 0 : i32
    return %c0_i32, %c0_i32_0 : i32, i32
  }
  func.func @transform_7(%arg0: i32) -> (i32, i32) {
    %c0_i32 = arith.constant 0 : i32
    %c0_i32_0 = arith.constant 0 : i32
    %c0_i32_1 = arith.constant 0 : i32
    return %c0_i32, %c0_i32_0 : i32, i32
  }
  func.func @transform_8(%arg0: i32) -> (i32, i32) {
    %c0_i32 = arith.constant 0 : i32
    %c0_i32_0 = arith.constant 0 : i32
    %c0_i32_1 = arith.constant 0 : i32
    return %c0_i32, %c0_i32_0 : i32, i32
  }
  func.func @transform_9(%arg0: i32) -> (i32, i32) {
    %c0_i32 = arith.constant 0 : i32
    %c0_i32_0 = arith.constant 0 : i32
    %c0_i32_1 = arith.constant 0 : i32
    return %c0_i32, %c0_i32_0 : i32, i32
  }
}

</mosaic_0001>

<bundles_post_ra>
// kernel: tpu_custom_call.1
= control target key start
LH: loop header
LB: loop body
LE: loop exit
PB: predicated region body
PF: predicated region fallthrough
CT: control target
= control target key end

     0   :  { %15 = vsyncpa [#allocation3], 0  ;;  %s685_s0 = inlined_call_operand.hbm [shape: f32[8,256], index: 0, kind: input, shape index: {}]   ;;  %s686_s1 = inlined_call_operand.hbm [shape: f32[8,256], index: 1, kind: input, shape index: {}]   ;;  %s687_s2 = inlined_call_operand.hbm [shape: f32[8,8], index: 2, kind: input, shape index: {}]   ;;  %s688_s3 = inlined_call_operand.hbm [shape: f32[8,8], index: 3, kind: input, shape index: {}]   ;;  %s689_s4 = inlined_call_operand.hbm [shape: f32[8,8], index: 4, kind: input, shape index: {}]   ;;  %s690_s5 = inlined_call_operand.vmem [shape: f32[8,8], index: 5, kind: input, shape index: {}]   ;;  %s691_s6 = inlined_call_operand.vmem [shape: f32[8,1], index: 6, kind: output, shape index: {0}]   ;;  %s692_s7 = inlined_call_operand.vmem [shape: f32[8,1], index: 7, kind: output, shape index: {1}]   ;;  %s693_s8 = inlined_call_operand.vmem [shape: f32[8,1], index: 8, kind: output, shape index: {2}]   ;;  %s694_s9 = inlined_call_operand.vmem [shape: f32[8,1], index: 9, kind: output, shape index: {3}]  }
   0x1   :  { %16 = vsyncpa [#allocation5], 0 }
   0x2   :  { %17 = vsyncpa [#allocation8], 0  ;;  %s563_s30 = smov [#allocation4]   ;;  %s564_s11 = smov [#allocation7]  }
   0x3   :  { %s34_s10 = sshll.u32 %s563_s30, 4  ;;  %s54_s12 = sshll.u32 %s564_s11, 4  ;;  %s35_s10 = int_to_ptr.vmem [resolvable:$true] %s34_s10  ;;  %s55_s12 = int_to_ptr.vmem [resolvable:$true] %s54_s12 }
   0x4   :  { %s465_s13 = scalar_lea.vmem %s35_s10, 256  ;;  %p470_p1 = scmp.lt.s32.totalorder %s35_s10, %s35_s10 }
   0x5   :  { %p466_p0 = scmp.ne.s32.totalorder %s35_s10, %s465_s13  ;;  %p471_p2 = scmp.lt.s32.totalorder %s465_s13, %s465_s13 }
   0x7   :  { %p472_p3 = por %p471_p2, %p470_p1 }
   0x9   :  { %p473_p4 = pnand %p472_p3, %p466_p0 }
   0xb   :  { %476 = shalt.err (!%p473_p4)
}
   0xc   :  { %37 = dma.hbm_to_vmem [thread:$0]  %s686_s1, 256, %s35_s10, [#allocation5]  }
   0xd   :  { %s485_s16 = scalar_lea.vmem %s55_s12, 128  ;;  %p490_p6 = scmp.lt.s32.totalorder %s55_s12, %s55_s12 }
   0xe   :  { %p486_p5 = scmp.ne.s32.totalorder %s55_s12, %s485_s16  ;;  %p491_p7 = scmp.lt.s32.totalorder %s485_s16, %s485_s16 }
  0x10   :  { %p492_p8 = por %p491_p7, %p490_p6 }
  0x12   :  { %p493_p9 = pnand %p492_p8, %p486_p5 }
  0x14   :  { %496 = shalt.err (!%p493_p9)
}
  0x15   :  { %57 = dma.hbm_to_vmem [thread:$0]  %s688_s3, 128, %s55_s12, [#allocation8]  }
  0x16   :  { %s565_s19 = smov [#allocation2]   ;;  %s566_s21 = smov [#allocation6]  }
  0x17   :  { %s24_s20 = sshll.u32 %s565_s19, 4  ;;  %s44_s22 = sshll.u32 %s566_s21, 4  ;;  %s25_s20 = int_to_ptr.vmem [resolvable:$true] %s24_s20  ;;  %s45_s22 = int_to_ptr.vmem [resolvable:$true] %s44_s22 }
  0x18   :  { %s505_s23 = scalar_lea.vmem %s25_s20, 256  ;;  %p510_p11 = scmp.lt.s32.totalorder %s25_s20, %s25_s20 }
  0x19   :  { %p506_p10 = scmp.ne.s32.totalorder %s25_s20, %s505_s23  ;;  %p511_p12 = scmp.lt.s32.totalorder %s505_s23, %s505_s23 }
  0x1b   :  { %p512_p13 = por %p511_p12, %p510_p11 }
  0x1d   :  { %p513_p0 = pnand %p512_p13, %p506_p10 }
  0x1f   :  { %516 = shalt.err (!%p513_p0)
}
  0x20   :  { %27 = dma.hbm_to_vmem [thread:$0]  %s685_s0, 256, %s25_s20, [#allocation3]  }
  0x21   :  { %s525_s25 = scalar_lea.vmem %s45_s22, 128  ;;  %p530_p2 = scmp.lt.s32.totalorder %s45_s22, %s45_s22 }
  0x22   :  { %p526_p1 = scmp.ne.s32.totalorder %s45_s22, %s525_s25  ;;  %p531_p3 = scmp.lt.s32.totalorder %s525_s25, %s525_s25 }
  0x24   :  { %p532_p4 = por %p531_p3, %p530_p2 }
  0x26   :  { %p533_p5 = pnand %p532_p4, %p526_p1 }
  0x28   :  { %536 = shalt.err (!%p533_p5)
}
  0x29   :  { %47 = dma.hbm_to_vmem [thread:$0]  %s687_s2, 128, %s45_s22, [#allocation5]  }
  0x2a   :  { %s567_s27 = smov [#allocation9]  }
  0x2b   :  { %s64_s28 = sshll.u32 %s567_s27, 4  ;;  %s65_s28 = int_to_ptr.vmem [resolvable:$true] %s64_s28 }
  0x2c   :  { %s545_s29 = scalar_lea.vmem %s65_s28, 128  ;;  %p550_p7 = scmp.lt.s32.totalorder %s65_s28, %s65_s28 }
  0x2d   :  { %p546_p6 = scmp.ne.s32.totalorder %s65_s28, %s545_s29  ;;  %p551_p8 = scmp.lt.s32.totalorder %s545_s29, %s545_s29 }
  0x2f   :  { %p552_p9 = por %p551_p8, %p550_p7 }
  0x31   :  { %p553_p10 = pnand %p552_p9, %p546_p6 }
  0x33   :  { %556 = shalt.err (!%p553_p10)
}
  0x34   :  { %67 = dma.hbm_to_vmem [thread:$0]  %s689_s4, 128, %s65_s28, [#allocation8]  }
  0x35   :  { %557 = dma.done.wait [#allocation3], 256  }
  0x36   :  { %558 = vsyncadd [#allocation3], 4294967040 }
  0x37   :  { %559 = dma.done.wait [#allocation5], 384  }
  0x38   :  { %560 = vsyncadd [#allocation5], 4294966912 }
  0x39   :  { %561 = dma.done.wait [#allocation8], 256  }
  0x3a   :  { %562 = vsyncadd [#allocation8], 4294967040  ;;  %v568_v0 = vmov 0.0   ;;  %v97_v1 = vld [vmem:[#allocation4 + $0x8] sm:$0xff]  ;;  %v95_v2 = vld [vmem:[#allocation2 + $0x8] sm:$0xff]  ;;  %vm100_vm0 = vcmask 64512  }
  0x3b   :  { %168 = vmatprep.mubr.f32.mxu0 %v568_v0  ;;  %242 = vmatprep.mubr.f32.mxu1 %v568_v0  ;;  %v96_v3 = vld [vmem:[#allocation4] sm:$0xff]  ;;  %v94_v4 = vld [vmem:[#allocation2] sm:$0xff]  ;;  %v99_v5 = vld [vmem:[#allocation7] sm:$0xff]  ;;  %vm89_vm1 = vcmask 7168  }
  0x3c   :  { %134 = vmatprep.subr.mxu0 %v97_v1  ;;  %208 = vmatprep.subr.mxu1 %v95_v2  ;;  %v98_v6 = vld [vmem:[#allocation6] sm:$0xff]  ;;  %v249_v8 = vld [vmem:[#allocation9] sm:$0xff]  ;;  %90 = vst.msk [vmem:[%s691_s6] sm:$0xff] %vm89_vm1, %v568_v0  ;;  %91 = vst.msk [vmem:[%s692_s7] sm:$0xff] %vm89_vm1, %v568_v0 }
  0x3d   :  { %135 = vmatpush1.msra.mxu0 %v96_v3  ;;  %209 = vmatpush1.msra.mxu1 %v94_v4  ;;  %v250_v7 = vld [vmem:[%s690_s5] sm:$0xff]  ;;  %92 = vst.msk [vmem:[%s693_s8] sm:$0xff] %vm89_vm1, %v568_v0  ;;  %93 = vst.msk [vmem:[%s694_s9] sm:$0xff] %vm89_vm1, %v568_v0 }
  0x3e   :  { %447 = vmatmul.mubr.msk.f32.vlgmr.msra.gmra.mxu0 %vm100_vm0, %v99_v5  ;;  %448 = vmatmul.mubr.msk.f32.vlgmr.msra.gmra.mxu1 %vm100_vm0, %v98_v6 }
  0x3f   :  { %284 = vmatprep.subr.mxu0 %v97_v1  ;;  %358 = vmatprep.subr.mxu1 %v95_v2 }
  0x40   :  { %285 = vmatpush1.msra.mxu0 %v96_v3  ;;  %359 = vmatpush1.msra.mxu1 %v94_v4 }
  0x41   :  { %318 = vmatprep.mubr.f32.mxu0 %v568_v0  ;;  %392 = vmatprep.mubr.f32.mxu1 %v568_v0 }
  0x42   :  { %449 = vmatmul.mubr.msk.f32.vlgmr.msra.gmra.mxu0 %vm100_vm0, %v250_v7  ;;  %450 = vmatmul.mubr.msk.f32.vlgmr.msra.gmra.mxu1 %vm100_vm0, %v249_v8 }
  0x43   :  { %v399_v29 = vld [vmem:[%s691_s6] sm:$0xff] }
  0x44   :  { %v414_v32 = vld [vmem:[%s693_s8] sm:$0xff] }
  0x45   :  { %v406_v33 = vld [vmem:[%s692_s7] sm:$0xff] }
  0x46   :  { %v420_v38 = vld [vmem:[%s694_s9] sm:$0xff] }
  0xfe   :  { %v170_v9 = vpop.f32.mrf.mxu0  ;;  %v244_v10 = vpop.f32.mrf.mxu1 }
  0xff   :  { %v245_v13 = vadd.f32 %v244_v10, %v170_v9 }
 0x100   :  { %v172_v11 = vpop.f32.mrf.mxu0  ;;  %v246_v12 = vpop.f32.mrf.mxu1 }
 0x101   :  { %v247_v14 = vadd.f32 %v246_v12, %v172_v11  ;;  %v407_v21 = vmul.f32 %v245_v13, %v245_v13 }
 0x102   :  { %v320_v15 = vpop.f32.mrf.mxu0  ;;  %v394_v16 = vpop.f32.mrf.mxu1 }
 0x103   :  { %v408_v17 = vmul.f32 %v247_v14, %v247_v14  ;;  %v400_v18 = vadd.f32 %v247_v14, %v245_v13  ;;  %v395_v22 = vadd.f32 %v394_v16, %v320_v15 }
 0x104   :  { %v322_v19 = vpop.f32.mrf.mxu0  ;;  %v396_v20 = vpop.f32.mrf.mxu1 }
 0x105   :  { %v397_v23 = vadd.f32 %v396_v20, %v322_v19  ;;  %401 = vadd.xlane.f32.xlu0 %v400_v18  ;;  %v409_v26 = vadd.f32 %v408_v17, %v407_v21  ;;  %v421_v27 = vmul.f32 %v395_v22, %v395_v22 }
 0x107   :  { %v422_v24 = vmul.f32 %v397_v23, %v397_v23  ;;  %v415_v25 = vadd.f32 %v397_v23, %v395_v22 }
 0x109   :  { %416 = vadd.xlane.f32.xlu1 %v415_v25  ;;  %410 = vadd.xlane.f32.xlu0 %v409_v26  ;;  %v423_v28 = vadd.f32 %v422_v24, %v421_v27 }
 0x10d   :  { %424 = vadd.xlane.f32.xlu1 %v423_v28 }
 0x18e   :  { %v402_v30 = vpop.xlane.xlu0 %401 }
 0x18f   :  { %v403_v31 = vadd.f32 %v402_v30, %v399_v29 }
 0x191   :  { %405 = vst.msk [vmem:[%s691_s6] sm:$0xff] %vm89_vm1, %v403_v31 }
 0x192   :  { %v417_v34 = vpop.xlane.xlu1 %416  ;;  %v411_v35 = vpop.xlane.xlu0 %410 }
 0x193   :  { %v418_v36 = vadd.f32 %v417_v34, %v414_v32  ;;  %v412_v37 = vadd.f32 %v411_v35, %v406_v33 }
 0x195   :  { %419 = vst.msk [vmem:[%s693_s8] sm:$0xff] %vm89_vm1, %v418_v36  ;;  %413 = vst.msk [vmem:[%s692_s7] sm:$0xff] %vm89_vm1, %v412_v37 }
 0x196   :  { %v425_v39 = vpop.xlane.xlu1 %424 }
 0x197   :  { %v426_v40 = vadd.f32 %v425_v39, %v420_v38 }
 0x199   :  { %427 = vst.msk [vmem:[%s694_s9] sm:$0xff] %vm89_vm1, %v426_v40 }
 0x19a   :  { %444 = vsyncpa [#allocation3], 1 }
 0x19b   :  { %445 = vsyncpa [#allocation5], 1 }
 0x19c   :  { %446 = vsyncpa [#allocation8], 1 }

</bundles_post_ra>
